<compile_context>
chip_gen: v5e
topology: v5e:2x2
jax: 0.10.0
libtpu: 0.0.40
codegen_flags: <defaults>
</compile_context>

<pallas_src>
import functools

import jax
import jax.numpy as jnp
from jax.experimental import pallas as pl
from jax.experimental.pallas import tpu as pltpu

NZ = 8          # latent dim (discriminator input features)
H_DIM = 256     # hidden dim
K_AUG = NZ + 1  # layer-1 contraction depth with the bias row folded in


def _select_batch_tiling(B, max_tile_lanes, prefer_min_steps=2):
    """Pick (tile_b, padded_B).

    * tile_b is a multiple of 128 lanes and divides the 128-rounded batch,
      so padding never adds a whole extra tile.
    * For batches >= 2*128 lanes the grid keeps >= 2 steps so the "parallel"
      batch axis shards across both TensorCores on v7x (harmless on 1-TC
      v5e/v6e).
    """
    n = (B + 127) // 128                     # batch size in 128-lane units
    cap = max(1, max_tile_lanes // 128)
    if n >= prefer_min_steps:
        limit = max(1, min(cap, n // prefer_min_steps))
    else:
        limit = max(1, min(cap, n))
    tile_units = 1
    for cand in range(limit, 0, -1):         # largest divisor of n <= limit
        if n % cand == 0:
            tile_units = cand
            break
    return tile_units * 128, n * 128


def _discriminator_kernel(xT_ref, w1_ref, w2_ref, b2_ref, o_ref):
    # Layer 1 entirely on the MXU; b1 is folded into the contraction as an
    # extra ones row of x^T / extra column of w1 (K = 8 -> 9), so there is no
    # separate VPU bias-add pass over the [H, TB] tile.
    h = jnp.dot(w1_ref[...], xT_ref[...], preferred_element_type=jnp.float32)
    h = jnp.maximum(h, 0.0)                  # ReLU: single VPU pass

    # Layer 2 (256 -> 1) also on the MXU: [1, H] @ [H, TB] -> [1, TB].
    z = jnp.dot(w2_ref[...], h, preferred_element_type=jnp.float32)
    z = z + b2_ref[0]                        # scalar bias from SMEM

    # Exact sigmoid (EUP exp + exact divide); EUP is far from saturated.
    o_ref[...] = (1.0 / (1.0 + jnp.exp(-z))).astype(o_ref.dtype)


@functools.partial(jax.jit, static_argnames=("max_tile_lanes",))
def discriminator_forward(x, w1, b1, w2, b2, *, max_tile_lanes=2048):
    """x: [B, NZ], w1: [NZ, H], b1: [H], w2: [H, 1], b2: [1] -> [B, 1] f32."""
    B = x.shape[0]
    tb, b_pad = _select_batch_tiling(B, max_tile_lanes)
    grid = (b_pad // tb,)

    # Kernel-side layouts: batch on lanes, features on sublanes.
    # Build the K-augmented, padded x^T in one producer (transpose + pad +
    # ones row); allow_input_fusion lets XLA fuse it into the pallas_call.
    xT_aug = jnp.zeros((K_AUG, b_pad), jnp.float32)
    xT_aug = xT_aug.at[NZ, :].set(1.0)
    xT_aug = xT_aug.at[:NZ, :B].set(x.T.astype(jnp.float32))

    w1_aug = jnp.concatenate(
        [w1.T.astype(jnp.float32), b1.reshape(H_DIM, 1).astype(jnp.float32)],
        axis=1,
    )                                                    # [H, NZ+1], resident
    w2_row = w2.reshape(1, H_DIM).astype(jnp.float32)    # [1, H], resident
    b2_s = b2.reshape((1,)).astype(jnp.float32)          # scalar, SMEM

    cost = pl.CostEstimate(
        flops=2 * b_pad * (K_AUG * H_DIM + H_DIM),
        transcendentals=b_pad,
        bytes_accessed=4 * (K_AUG * b_pad + H_DIM * K_AUG + H_DIM + 1 + b_pad),
    )

    out_row = pl.pallas_call(
        _discriminator_kernel,
        out_shape=jax.ShapeDtypeStruct((1, b_pad), jnp.float32),
        grid=grid,
        in_specs=[
            pl.BlockSpec((K_AUG, tb), lambda i: (0, i)),        # x^T (pipelined)
            pl.BlockSpec((H_DIM, K_AUG), lambda i: (0, 0)),     # [w1 | b1] resident
            pl.BlockSpec((1, H_DIM), lambda i: (0, 0)),         # w2 row resident
            pl.BlockSpec(memory_space=pltpu.MemorySpace.SMEM),  # b2 scalar
        ],
        out_specs=pl.BlockSpec((1, tb), lambda i: (0, i)),      # lane-dense out
        compiler_params=pltpu.CompilerParams(
            dimension_semantics=("parallel",),
            allow_input_fusion=[True, False, False, False],
        ),
        cost_estimate=cost,
    )(xT_aug, w1_aug, w2_row, b2_s)

    return out_row[0, :B].reshape(B, 1)


def init_params(key):
    """Deterministic init matching PyTorch nn.Linear default U(-1/sqrt(fan_in), +)."""
    k1, k2, k3, k4 = jax.random.split(key, 4)
    bound1 = 1.0 / jnp.sqrt(NZ)
    bound2 = 1.0 / jnp.sqrt(H_DIM)
    w1 = jax.random.uniform(k1, (NZ, H_DIM), jnp.float32, -bound1, bound1)
    b1 = jax.random.uniform(k2, (H_DIM,), jnp.float32, -bound1, bound1)
    w2 = jax.random.uniform(k3, (H_DIM, 1), jnp.float32, -bound2, bound2)
    b2 = jax.random.uniform(k4, (1,), jnp.float32, -bound2, bound2)
    return w1, b1, w2, b2


if __name__ == "__main__":
    key = jax.random.PRNGKey(0)
    k_params, k_x1, k_x2 = jax.random.split(key, 3)
    w1, b1, w2, b2 = init_params(k_params)

    def ref_forward(x):
        h = jnp.maximum(
            jnp.dot(x, w1, precision=jax.lax.Precision.HIGHEST) + b1, 0.0)
        z = jnp.dot(h, w2, precision=jax.lax.Precision.HIGHEST) + b2
        return jax.nn.sigmoid(z)

    # Small batch: single 128-lane tile (exercises tail padding).
    x_small = jax.random.normal(k_x1, (16, NZ), jnp.float32)
    out_small = jax.block_until_ready(
        discriminator_forward(x_small, w1, b1, w2, b2))
    assert out_small.shape == (16, 1)
    assert jnp.allclose(out_small, ref_forward(x_small), atol=1e-3), \
        "mismatch vs reference (small batch)"

    # Larger batch: multi-step grid (>=2 steps -> both TCs on v7x) + padding.
    x_big = jax.random.normal(k_x2, (300, NZ), jnp.float32)
    out_big = jax.block_until_ready(
        discriminator_forward(x_big, w1, b1, w2, b2))
    assert out_big.shape == (300, 1)
    assert jnp.allclose(out_big, ref_forward(x_big), atol=1e-3), \
        "mismatch vs reference (large batch)"

    print("KERNEL_OK")
</pallas_src>

<mosaic_0001>
module attributes {stable_mosaic.version = 11 : i64} {
  func.func @_discriminator_kernel(%arg0: i32, %arg1: memref<9x128xf32, #tpu.memory_space<vmem>>, %arg2: memref<256x9xf32, #tpu.memory_space<vmem>>, %arg3: memref<1x256xf32, #tpu.memory_space<vmem>>, %arg4: memref<1xf32, #tpu.memory_space<smem>>, %arg5: memref<1x128xf32, #tpu.memory_space<vmem>>) attributes {dimension_semantics = [#tpu.dimension_semantics<parallel>], iteration_bounds = array<i64: 1>, scalar_prefetch = 0 : i64, scratch_operands = 0 : i64, tpu.core_type = #tpu.core_type<tc>, window_params = [{transform_indices = @transform_0, window_bounds = array<i64: 9, 128>}, {pipeline_mode = #tpu.pipeline_mode<synchronous>, transform_indices = @transform_1, window_bounds = array<i64: 256, 9>}, {pipeline_mode = #tpu.pipeline_mode<synchronous>, transform_indices = @transform_2, window_bounds = array<i64: 1, 256>}, {transform_indices = @transform_3, window_bounds = array<i64: 1>}, {transform_indices = @transform_4, window_bounds = array<i64: 1, 128>}]} {
    %c0 = arith.constant 0 : index
    %c0_0 = arith.constant 0 : index
    %0 = vector.load %arg2[%c0, %c0_0] : memref<256x9xf32, #tpu.memory_space<vmem>>, vector<256x9xf32>
    %c0_1 = arith.constant 0 : index
    %c0_2 = arith.constant 0 : index
    %1 = vector.load %arg1[%c0_1, %c0_2] : memref<9x128xf32, #tpu.memory_space<vmem>>, vector<9x128xf32>
    %cst = arith.constant dense<0.000000e+00> : vector<256x128xf32>
    %2 = tpu.matmul %0, %1, %cst {dimension_numbers = #tpu.dot_dimension_numbers<[1], [0], [0], [1], [0, 0, 1, 1], [], []>} : vector<256x9xf32>, vector<9x128xf32>, vector<256x128xf32> -> vector<256x128xf32>
    %cst_3 = arith.constant 0.000000e+00 : f32
    %3 = vector.broadcast %cst_3 : f32 to vector<256x128xf32>
    %4 = arith.maximumf %2, %3 : vector<256x128xf32>
    %c0_4 = arith.constant 0 : index
    %c0_5 = arith.constant 0 : index
    %5 = vector.load %arg3[%c0_4, %c0_5] : memref<1x256xf32, #tpu.memory_space<vmem>>, vector<1x256xf32>
    %cst_6 = arith.constant dense<0.000000e+00> : vector<1x128xf32>
    %6 = tpu.matmul %5, %4, %cst_6 {dimension_numbers = #tpu.dot_dimension_numbers<[1], [0], [0], [1], [0, 0, 1, 1], [], []>} : vector<1x256xf32>, vector<256x128xf32>, vector<1x128xf32> -> vector<1x128xf32>
    %c0_7 = arith.constant 0 : index
    %7 = memref.load %arg4[%c0_7] : memref<1xf32, #tpu.memory_space<smem>>
    %8 = vector.broadcast %7 : f32 to vector<1x128xf32>
    %9 = arith.addf %6, %8 : vector<1x128xf32>
    %cst_8 = arith.constant 0.000000e+00 : f32
    %10 = vector.broadcast %cst_8 : f32 to vector<1x128xf32>
    %11 = arith.subf %10, %9 : vector<1x128xf32>
    %12 = math.exp %11 : vector<1x128xf32>
    %cst_9 = arith.constant 1.000000e+00 : f32
    %13 = vector.broadcast %cst_9 : f32 to vector<1x128xf32>
    %14 = arith.addf %13, %12 : vector<1x128xf32>
    %cst_10 = arith.constant 1.000000e+00 : f32
    %15 = vector.broadcast %cst_10 : f32 to vector<1x128xf32>
    %16 = arith.divf %15, %14 : vector<1x128xf32>
    %c0_11 = arith.constant 0 : index
    %c0_12 = arith.constant 0 : index
    %17 = vector.load %arg5[%c0_11, %c0_12] : memref<1x128xf32, #tpu.memory_space<vmem>>, vector<1x128xf32>
    tpu.vector_store %arg5[%c0_11, %c0_12], %16 {strides = array<i32>} : memref<1x128xf32, #tpu.memory_space<vmem>>, vector<1x128xf32>,
    return
  }
  func.func @transform_0(%arg0: i32) -> (i32, i32) {
    %c0_i32 = arith.constant 0 : i32
    %c0_i32_0 = arith.constant 0 : i32
    return %c0_i32, %arg0 : i32, i32
  }
  func.func @transform_1(%arg0: i32) -> (i32, i32) {
    %c0_i32 = arith.constant 0 : i32
    %c0_i32_0 = arith.constant 0 : i32
    %c0_i32_1 = arith.constant 0 : i32
    return %c0_i32, %c0_i32_0 : i32, i32
  }
  func.func @transform_2(%arg0: i32) -> (i32, i32) {
    %c0_i32 = arith.constant 0 : i32
    %c0_i32_0 = arith.constant 0 : i32
    %c0_i32_1 = arith.constant 0 : i32
    return %c0_i32, %c0_i32_0 : i32, i32
  }
  func.func @transform_3(%arg0: i32) -> i32 {
    %c0_i32 = arith.constant 0 : i32
    %c0_i32_0 = arith.constant 0 : i32
    return %c0_i32 : i32
  }
  func.func @transform_4(%arg0: i32) -> (i32, i32) {
    %c0_i32 = arith.constant 0 : i32
    %c0_i32_0 = arith.constant 0 : i32
    return %c0_i32, %arg0 : i32, i32
  }
}

</mosaic_0001>

<bundles_post_ra>
// kernel: discriminator_forward.1
= control target key start
LH: loop header
LB: loop body
LE: loop exit
PB: predicated region body
PF: predicated region fallthrough
CT: control target
= control target key end

     0   :  { %vm149_vm0 = vcmask 1040384   ;;  %vm52_vm1 = vcmask 72704   ;;  %s605_s0 = inlined_call_operand.vmem [shape: f32[9,128], index: 0, kind: input, shape index: {}]   ;;  %s606_s1 = inlined_call_operand.vmem [shape: f32[256,9], index: 1, kind: input, shape index: {}]   ;;  %s607_s2 = inlined_call_operand.vmem [shape: f32[1,256], index: 2, kind: input, shape index: {}]   ;;  %s608_s3 = inlined_call_operand.<no memory space> [shape: f32[1], index: 3, kind: input, shape index: {}]   ;;  %s609_s4 = inlined_call_operand.vmem [shape: f32[1,128], index: 4, kind: output, shape index: {}]  }
   0x1   :  { %v51_v0 = vld [vmem:[%s605_s0 + $0x8] sm:$0x1]  ;;  %v50_v1 = vld [vmem:[%s605_s0] sm:$0xff]  ;;  %v40_v3 = vld [vmem:[%s606_s1 + $0xb0] sm:$0xff] }
   0x2   :  { %370 = vmatpush.msk.msra.mxu0 %vm149_vm0, %v51_v0  ;;  %405 = vmatpush.msk.msra.mxu3 %vm149_vm0, %v51_v0  ;;  %v18_v2 = vld [vmem:[%s606_s1] sm:$0xff]  ;;  %v29_v4 = vld [vmem:[%s606_s1 + $0x58] sm:$0xff]  ;;  %v19_v5 = vld [vmem:[%s606_s1 + $0x8] sm:$0xff] }
   0x3   :  { %404 = vmatpush.msk.msra.mxu2 %vm149_vm0, %v51_v0  ;;  %403 = vmatpush.msk.msra.mxu1 %vm149_vm0, %v51_v0  ;;  %v41_v6 = vld [vmem:[%s606_s1 + $0xb8] sm:$0xff]  ;;  %v30_v7 = vld [vmem:[%s606_s1 + $0x60] sm:$0xff]  ;;  %v20_v9 = vld [vmem:[%s606_s1 + $0x10] sm:$0xff] }
   0x4   :  { %168 = vmatpush.msra.mxu0 %v50_v1  ;;  %408 = vmatpush.msra.mxu3 %v50_v1  ;;  %v33_v8 = vld [vmem:[%s606_s1 + $0x78] sm:$0xff]  ;;  %v42_v10 = vld [vmem:[%s606_s1 + $0xc0] sm:$0xff]  ;;  %v31_v11 = vld [vmem:[%s606_s1 + $0x68] sm:$0xff] }
   0x5   :  { %371 = vmatmul.msk.f32.vlgmr.msra.gmra.mxu0 %vm52_vm1, %v18_v2  ;;  %393 = vmatmul.msk.f32.vlgmr.msra.gmra.mxu3 %vm52_vm1, %v40_v3  ;;  %v34_v12 = vld [vmem:[%s606_s1 + $0x80] sm:$0xff]  ;;  %v21_v13 = vld [vmem:[%s606_s1 + $0x18] sm:$0xff]  ;;  %v43_v14 = vld [vmem:[%s606_s1 + $0xc8] sm:$0xff] }
   0x6   :  { %407 = vmatpush.msra.mxu2 %v50_v1  ;;  %406 = vmatpush.msra.mxu1 %v50_v1  ;;  %v32_v15 = vld [vmem:[%s606_s1 + $0x70] sm:$0xff]  ;;  %v35_v16 = vld [vmem:[%s606_s1 + $0x88] sm:$0xff]  ;;  %v22_v17 = vld [vmem:[%s606_s1 + $0x20] sm:$0xff] }
   0x7   :  { %382 = vmatmul.msk.f32.vlgmr.msra.gmra.mxu1 %vm52_vm1, %v29_v4  ;;  %386 = vmatmul.msk.f32.vlgmr.msra.gmra.mxu2 %vm52_vm1, %v33_v8  ;;  %v44_v18 = vld [vmem:[%s606_s1 + $0xd0] sm:$0xff]  ;;  %v23_v20 = vld [vmem:[%s606_s1 + $0x28] sm:$0xff]  ;;  %v45_v21 = vld [vmem:[%s606_s1 + $0xd8] sm:$0xff] }
   0x8   :  { %v36_v19 = vld [vmem:[%s606_s1 + $0x90] sm:$0xff]  ;;  %v37_v22 = vld [vmem:[%s606_s1 + $0x98] sm:$0xff]  ;;  %v46_v24 = vld [vmem:[%s606_s1 + $0xe0] sm:$0xff] }
   0x9   :  { %v24_v23 = vld [vmem:[%s606_s1 + $0x30] sm:$0xff]  ;;  %v38_v25 = vld [vmem:[%s606_s1 + $0xa0] sm:$0xff]  ;;  %v25_v26 = vld [vmem:[%s606_s1 + $0x38] sm:$0xff] }
   0xa   :  { %v47_v27 = vld [vmem:[%s606_s1 + $0xe8] sm:$0xff]  ;;  %v26_v29 = vld [vmem:[%s606_s1 + $0x40] sm:$0xff]  ;;  %v48_v30 = vld [vmem:[%s606_s1 + $0xf0] sm:$0xff] }
   0xb   :  { %v39_v28 = vld [vmem:[%s606_s1 + $0xa8] sm:$0xff]  ;;  %v49_v32 = vld [vmem:[%s606_s1 + $0xf8] sm:$0xff]  ;;  %v28_v33 = vld [vmem:[%s606_s1 + $0x50] sm:$0xff] }
   0xc   :  { %v27_v31 = vld [vmem:[%s606_s1 + $0x48] sm:$0xff] }
   0xd   :  { %372 = vmatmul.msk.f32.gmra.mxu0 %vm52_vm1, %v19_v5  ;;  %394 = vmatmul.msk.f32.gmra.mxu3 %vm52_vm1, %v41_v6 }
   0xf   :  { %383 = vmatmul.msk.f32.gmra.mxu1 %vm52_vm1, %v30_v7  ;;  %387 = vmatmul.msk.f32.gmra.mxu2 %vm52_vm1, %v34_v12 }
  0x15   :  { %373 = vmatmul.msk.f32.gmra.mxu0 %vm52_vm1, %v20_v9  ;;  %395 = vmatmul.msk.f32.gmra.mxu3 %vm52_vm1, %v42_v10 }
  0x17   :  { %384 = vmatmul.msk.f32.gmra.mxu1 %vm52_vm1, %v31_v11  ;;  %388 = vmatmul.msk.f32.gmra.mxu2 %vm52_vm1, %v35_v16 }
  0x1d   :  { %374 = vmatmul.msk.f32.gmra.mxu0 %vm52_vm1, %v21_v13  ;;  %396 = vmatmul.msk.f32.gmra.mxu3 %vm52_vm1, %v43_v14 }
  0x1f   :  { %385 = vmatmul.msk.f32.gmra.mxu1 %vm52_vm1, %v32_v15  ;;  %389 = vmatmul.msk.f32.gmra.mxu2 %vm52_vm1, %v36_v19 }
  0x25   :  { %375 = vmatmul.msk.f32.gmra.mxu0 %vm52_vm1, %v22_v17  ;;  %397 = vmatmul.msk.f32.gmra.mxu3 %vm52_vm1, %v44_v18 }
  0x27   :  { %390 = vmatmul.msk.f32.gmra.mxu2 %vm52_vm1, %v37_v22 }
  0x2d   :  { %376 = vmatmul.msk.f32.gmra.mxu0 %vm52_vm1, %v23_v20  ;;  %398 = vmatmul.msk.f32.gmra.mxu3 %vm52_vm1, %v45_v21 }
  0x2f   :  { %391 = vmatmul.msk.f32.gmra.mxu2 %vm52_vm1, %v38_v25 }
  0x35   :  { %377 = vmatmul.msk.f32.gmra.mxu0 %vm52_vm1, %v24_v23  ;;  %399 = vmatmul.msk.f32.gmra.mxu3 %vm52_vm1, %v46_v24 }
  0x37   :  { %392 = vmatmul.msk.f32.gmra.mxu2 %vm52_vm1, %v39_v28  ;;  %v298_v28 = vld [vmem:[%s607_s2] sm:$0x3] }
  0x3d   :  { %378 = vmatmul.msk.f32.gmra.mxu0 %vm52_vm1, %v25_v26  ;;  %400 = vmatmul.msk.f32.gmra.mxu3 %vm52_vm1, %v47_v27 }
  0x45   :  { %379 = vmatmul.msk.f32.gmra.mxu0 %vm52_vm1, %v26_v29  ;;  %401 = vmatmul.msk.f32.gmra.mxu3 %vm52_vm1, %v48_v30  ;;  %v302_v29 = vperm.slane %v298_v28, 0 }
  0x4d   :  { %380 = vmatmul.msk.f32.gmra.mxu0 %vm52_vm1, %v27_v31  ;;  %402 = vmatmul.msk.f32.gmra.mxu3 %vm52_vm1, %v49_v32 }
  0x55   :  { %381 = vmatmul.msk.f32.gmra.mxu0 %vm52_vm1, %v28_v33 }
  0x82   :  { %v572_v34 = vpop.f32.mrf.mxu0 }
  0x83   :  { %v266_v30 = vmax.f32 %v572_v34, 0.0  ;;  %v300_v34 = vstv %s608_s3 }
  0x84   :  { %v203_v35 = vpop.f32.mrf.mxu1 }
  0x85   :  { %v277_v51 = vmax.f32 %v203_v35, 0.0 }
  0x88   :  { %v574_v36 = vpop.f32.mrf.mxu3 }
  0x89   :  { %v288_v24 = vmax.f32 %v574_v36, 0.0  ;;  %v303_v36 = vperm.slane %v298_v28, 1 }
  0x8a   :  { %v576_v37 = vpop.f32.mrf.mxu0  ;;  %v215_v41 = vpop.f32.mrf.mxu2 }
  0x8b   :  { %v281_v42 = vmax.f32 %v215_v41, 0.0  ;;  %v267_v27 = vmax.f32 %v576_v37, 0.0 }
  0x8c   :  { %v206_v38 = vpop.f32.mrf.mxu1 }
  0x8d   :  { %306 = vmatpush.msrb.mxu1 %v281_v42  ;;  %v278_v49 = vmax.f32 %v206_v38, 0.0 }
  0x90   :  { %v578_v39 = vpop.f32.mrf.mxu3 }
  0x91   :  { %v289_v22 = vmax.f32 %v578_v39, 0.0 }
  0x92   :  { %v580_v40 = vpop.f32.mrf.mxu0  ;;  %v584_v55 = vpop.f32.mrf.mxu2 }
  0x93   :  { %v268_v25 = vmax.f32 %v580_v40, 0.0  ;;  %v282_v37 = vmax.f32 %v584_v55, 0.0 }
  0x94   :  { %v209_v43 = vpop.f32.mrf.mxu1 }
  0x95   :  { %v279_v47 = vmax.f32 %v209_v43, 0.0 }
  0x98   :  { %v242_v44 = vpop.f32.mrf.mxu3 }
  0x99   :  { %v290_v19 = vmax.f32 %v242_v44, 0.0 }
  0x9a   :  { %v582_v45 = vpop.f32.mrf.mxu0  ;;  %v586_v59 = vpop.f32.mrf.mxu2 }
  0x9b   :  { %v269_v23 = vmax.f32 %v582_v45, 0.0  ;;  %v283_v35 = vmax.f32 %v586_v59, 0.0 }
  0x9c   :  { %v212_v46 = vpop.f32.mrf.mxu1 }
  0x9d   :  { %v280_v48 = vmax.f32 %v212_v46, 0.0 }
  0x9f   :  { %307 = vmatpush.msrb.mxu1 %v280_v48 }
  0xa0   :  { %v245_v50 = vpop.f32.mrf.mxu3 }
  0xa1   :  { %308 = vmatpush.msrb.mxu1 %v279_v47  ;;  %v291_v17 = vmax.f32 %v245_v50, 0.0 }
  0xa2   :  { %v182_v52 = vpop.f32.mrf.mxu0  ;;  %v224_v63 = vpop.f32.mrf.mxu2 }
  0xa3   :  { %309 = vmatpush.msrb.mxu1 %v278_v49  ;;  %v270_v20 = vmax.f32 %v182_v52, 0.0  ;;  %v284_v33 = vmax.f32 %v224_v63, 0.0 }
  0xa5   :  { %310 = vmatpush.msrb.mxu1 %v277_v51 }
  0xa8   :  { %v248_v53 = vpop.f32.mrf.mxu3 }
  0xa9   :  { %v292_v15 = vmax.f32 %v248_v53, 0.0 }
  0xaa   :  { %v185_v54 = vpop.f32.mrf.mxu0  ;;  %v227_v2 = vpop.f32.mrf.mxu2 }
  0xab   :  { %v271_v18 = vmax.f32 %v185_v54, 0.0  ;;  %v285_v32 = vmax.f32 %v227_v2, 0.0 }
  0xb0   :  { %v251_v56 = vpop.f32.mrf.mxu3 }
  0xb1   :  { %v293_v13 = vmax.f32 %v251_v56, 0.0 }
  0xb2   :  { %v188_v57 = vpop.f32.mrf.mxu0  ;;  %v230_v10 = vpop.f32.mrf.mxu2 }
  0xb3   :  { %v272_v16 = vmax.f32 %v188_v57, 0.0  ;;  %v286_v31 = vmax.f32 %v230_v10, 0.0 }
  0xb8   :  { %v254_v58 = vpop.f32.mrf.mxu3 }
  0xb9   :  { %v294_v11 = vmax.f32 %v254_v58, 0.0 }
  0xba   :  { %v191_v60 = vpop.f32.mrf.mxu0  ;;  %v233_v21 = vpop.f32.mrf.mxu2 }
  0xbb   :  { %v273_v14 = vmax.f32 %v191_v60, 0.0  ;;  %v287_v26 = vmax.f32 %v233_v21, 0.0 }
  0xc0   :  { %v257_v61 = vpop.f32.mrf.mxu3 }
  0xc1   :  { %v295_v9 = vmax.f32 %v257_v61, 0.0 }
  0xc2   :  { %v194_v62 = vpop.f32.mrf.mxu0 }
  0xc3   :  { %v274_v12 = vmax.f32 %v194_v62, 0.0 }
  0xc8   :  { %v260_v0 = vpop.f32.mrf.mxu3 }
  0xc9   :  { %v296_v6 = vmax.f32 %v260_v0, 0.0 }
  0xca   :  { %v197_v1 = vpop.f32.mrf.mxu0 }
  0xcb   :  { %v275_v7 = vmax.f32 %v197_v1, 0.0 }
  0xd0   :  { %v263_v3 = vpop.f32.mrf.mxu3 }
  0xd1   :  { %v297_v4 = vmax.f32 %v263_v3, 0.0 }
  0xd2   :  { %v200_v5 = vpop.f32.mrf.mxu0 }
  0xd3   :  { %v276_v8 = vmax.f32 %v200_v5, 0.0  ;;  %326 = vmatpush.msrb.mxu2 %v297_v4 }
  0xd5   :  { %311 = vmatpush.msrb.mxu1 %v276_v8  ;;  %327 = vmatpush.msrb.mxu2 %v296_v6 }
  0xd7   :  { %312 = vmatpush.msrb.mxu1 %v275_v7  ;;  %328 = vmatpush.msrb.mxu2 %v295_v9 }
  0xd9   :  { %313 = vmatpush.msrb.mxu1 %v274_v12  ;;  %329 = vmatpush.msrb.mxu2 %v294_v11 }
  0xdb   :  { %314 = vmatpush.msrb.mxu1 %v273_v14  ;;  %330 = vmatpush.msrb.mxu2 %v293_v13 }
  0xdd   :  { %315 = vmatpush.msrb.mxu1 %v272_v16  ;;  %331 = vmatpush.msrb.mxu2 %v292_v15 }
  0xdf   :  { %316 = vmatpush.msrb.mxu1 %v271_v18  ;;  %332 = vmatpush.msrb.mxu2 %v291_v17 }
  0xe1   :  { %317 = vmatpush.msrb.mxu1 %v270_v20  ;;  %333 = vmatpush.msrb.mxu2 %v290_v19 }
  0xe3   :  { %318 = vmatpush.msrb.mxu1 %v269_v23  ;;  %334 = vmatpush.msrb.mxu2 %v289_v22 }
  0xe5   :  { %319 = vmatpush.msrb.mxu1 %v268_v25  ;;  %335 = vmatpush.msrb.mxu2 %v288_v24 }
  0xe7   :  { %320 = vmatpush.msrb.mxu1 %v267_v27  ;;  %336 = vmatpush.msrb.mxu2 %v287_v26 }
  0xe9   :  { %321 = vmatpush.msrb.mxu1 %v266_v30  ;;  %337 = vmatpush.msrb.mxu2 %v286_v31 }
  0xea   :  { %322 = vmatmul.f32.vlgmr.msrb.gmra.mxu1 %v302_v29 }
  0xeb   :  { %338 = vmatpush.msrb.mxu2 %v285_v32 }
  0xed   :  { %339 = vmatpush.msrb.mxu2 %v284_v33 }
  0xef   :  { %340 = vmatpush.msrb.mxu2 %v283_v35 }
  0xf1   :  { %341 = vmatpush.msrb.mxu2 %v282_v37 }
  0xf2   :  { %342 = vmatmul.f32.vlgmr.msrb.gmra.mxu2 %v303_v36 }
 0x167   :  { %v323_v38 = vpop.f32.mrf.mxu1 }
 0x168   :  { %v324_v39 = vadd.f32 %v323_v38, %v300_v34 }
 0x175   :  { %v343_v40 = vpop.f32.mrf.mxu2 }
 0x176   :  { %v344_v41 = vadd.f32 %v343_v40, %v324_v39 }
 0x178   :  { %v346_v42 = vsub.f32 0.0, %v344_v41 }
 0x17a   :  { %v347_v43 = vmul.f32 1.442695, %v346_v42 }
 0x17c   :  { %409 = vpow2.f32 %v347_v43 }
 0x182   :  { %v410_v44 = vpop.eup %409 }
 0x183   :  { %v349_v45 = vadd.f32 1.0, %v410_v44 }
 0x185   :  { %411 = vrcp.f32 %v349_v45  ;;  %v361_v49 = vand.u32 2147483648, %v349_v45  ;;  %v359_v51 = vand.u32 2147483647, %v349_v45  ;;  %vm355_vm3 = vweird.f32 %v349_v45 }
 0x187   :  { %v362_v53 = vor.u32 1.1754944e-38, %v361_v49  ;;  %vm360_vm5 = vcmp.eq.f32.partialorder %v359_v51, 8.507059e+37 }
 0x18b   :  { %v412_v46 = vpop.eup %411 }
 0x18c   :  { %v351_v47 = vmul.f32 %v412_v46, %v349_v45  ;;  %vm356_vm2 = vweird.f32 %v412_v46 }
 0x18d   :  { %vm357_vm4 = vmor %vm355_vm3, %vm356_vm2 }
 0x18e   :  { %v352_v48 = vsub.f32 1.0, %v351_v47 }
 0x190   :  { %v353_v50 = vmul.f32 %v412_v46, %v352_v48 }
 0x192   :  { %v354_v52 = vadd.f32 %v412_v46, %v353_v50 }
 0x194   :  { %v358_v54 = vsel %vm357_vm4, %v412_v46, %v354_v52 }
 0x195   :  { %v363_v55 = vsel %vm360_vm5, %v362_v53, %v358_v54 }
 0x196   :  { %365 = vst [vmem:[%s609_s4] sm:$0x1] %v363_v55 }

</bundles_post_ra>
